<compile_context>
chip_gen: v7x
topology: tpu7x:2x2x1
jax: 0.10.0
libtpu: 0.0.40
codegen_flags: <defaults>
</compile_context>

<pallas_src>
import math
from functools import partial

import numpy as np
import jax
import jax.numpy as jnp
from jax.experimental import pallas as pl
from jax.experimental.pallas import tpu as pltpu


# -----------------------------------------------------------------------------
# Host-side schedule buffers (float64 math, cast to f32 — mirrors register_buffer)
# -----------------------------------------------------------------------------
def _sigmoid_beta_schedule(timesteps, start=-3.0, end=3.0, tau=1.0):
    steps = timesteps + 1
    t = np.linspace(0, timesteps, steps, dtype=np.float64) / timesteps
    sig = lambda z: 1.0 / (1.0 + np.exp(-np.asarray(z, dtype=np.float64)))
    v_start, v_end = sig(start / tau), sig(end / tau)
    ac = (-sig((t * (end - start) + start) / tau) + v_end) / (v_end - v_start)
    ac = ac / ac[0]
    betas = 1.0 - ac[1:] / ac[:-1]
    return np.clip(betas, 0.0, 0.999)


def make_diffusion_buffers(timesteps=1000, min_snr_loss_weight=False, min_snr_gamma=5.0):
    betas = _sigmoid_beta_schedule(timesteps)
    alphas = 1.0 - betas
    ac = np.cumprod(alphas)
    snr = ac / (1.0 - ac)
    maybe_clipped = np.minimum(snr, min_snr_gamma) if min_snr_loss_weight else snr
    loss_weight = maybe_clipped / snr  # objective == 'pred_noise' (identically 1.0 here)
    f32 = lambda a: jnp.asarray(a, dtype=jnp.float32)
    return dict(
        sqrt_alphas_cumprod=f32(np.sqrt(ac)),
        sqrt_one_minus_alphas_cumprod=f32(np.sqrt(1.0 - ac)),
        loss_weight=f32(loss_weight),
    )


# -----------------------------------------------------------------------------
# Tiling helper: rows-per-block, targeting ~2 MiB per f32 data block.  With
# 3 streamed arrays x 2 buffers that is ~12 MiB VMEM — safe on v5e/v6e/v7x.
# -----------------------------------------------------------------------------
_TARGET_BLOCK_BYTES = 2 * 1024 * 1024
_VMEM_LIMIT_BYTES = 48 * 1024 * 1024


def _pick_row_block(total_rows, hw):
    target_rows = max(8, _TARGET_BLOCK_BYTES // (hw * 4))
    if total_rows <= target_rows:
        return total_rows                          # single full-extent row block
    best = None
    for r in range(8, target_rows + 1, 8):         # multiple-of-8 divisor (full sublanes)
        if total_rows % r == 0:
            best = r
    if best is not None:
        return best
    for r in range(target_rows, 0, -1):            # fallback: any divisor
        if total_rows % r == 0:
            return r
    return total_rows


# -----------------------------------------------------------------------------
# Kernel 1: normalize + q_sample  (rows = collapsed (B, C); per-row coeff columns)
# -----------------------------------------------------------------------------
def _q_sample_kernel(c1_ref, c2_ref, img_ref, noise_ref, out_ref):
    x_start = img_ref[...] * 2.0 - 1.0                     # normalize_to_neg_one_to_one
    out_ref[...] = c1_ref[...] * x_start + c2_ref[...] * noise_ref[...]


def q_sample_normalized(img, t, noise, sqrt_ac, sqrt_om_ac):
    """img in [0,1], (B,C,H,W) -> x_t = sqrt_ac[t]*(2*img-1) + sqrt_om_ac[t]*noise."""
    B, C, H, W = img.shape
    HW = H * W
    R = B * C
    img2 = img.reshape(R, HW).astype(jnp.float32)
    noise2 = noise.reshape(R, HW).astype(jnp.float32)
    # Tiny (B,) gathers done by XLA in the wrapper; expanded to per-row columns so a
    # block can span rows with different timesteps.
    c1 = jnp.repeat(sqrt_ac[t].astype(jnp.float32), C).reshape(R, 1)
    c2 = jnp.repeat(sqrt_om_ac[t].astype(jnp.float32), C).reshape(R, 1)

    rows = _pick_row_block(R, HW)
    grid = (R // rows,)
    n_el = R * HW

    out = pl.pallas_call(
        _q_sample_kernel,
        out_shape=jax.ShapeDtypeStruct((R, HW), jnp.float32),
        grid=grid,
        in_specs=[
            pl.BlockSpec((rows, 1), lambda r: (r, 0)),      # c1 column
            pl.BlockSpec((rows, 1), lambda r: (r, 0)),      # c2 column
            pl.BlockSpec((rows, HW), lambda r: (r, 0)),     # img
            pl.BlockSpec((rows, HW), lambda r: (r, 0)),     # noise
        ],
        out_specs=pl.BlockSpec((rows, HW), lambda r: (r, 0)),
        compiler_params=pltpu.CompilerParams(
            dimension_semantics=("parallel",),
            vmem_limit_bytes=_VMEM_LIMIT_BYTES),
        cost_estimate=pl.CostEstimate(
            flops=4 * n_el, transcendentals=0, bytes_accessed=3 * n_el * 4),
    )(c1, c2, img2, noise2)
    return out.reshape(B, C, H, W)


# -----------------------------------------------------------------------------
# Kernel 2: weighted L1 loss; VMEM vector-scratch accumulation, one final reduce
# -----------------------------------------------------------------------------
def _weighted_l1_kernel(w_ref, pred_ref, noise_ref, out_ref, acc_ref, *, inv_total):
    r = pl.program_id(0)

    @pl.when(r == 0)
    def _():
        acc_ref[...] = jnp.zeros_like(acc_ref)
        out_ref[...] = jnp.zeros_like(out_ref)

    weighted = jnp.abs(pred_ref[...] - noise_ref[...]) * w_ref[...]   # (rows, HW)
    rows, hw = weighted.shape
    if rows >= 8 and rows % 8 == 0:
        # Fold row groups onto an (8, HW) partial-sum buffer: pure VPU vreg adds,
        # no cross-lane/sublane movement on the per-step path.
        acc_ref[...] = acc_ref[...] + weighted.reshape(rows // 8, 8, hw).sum(axis=0)
    else:
        acc_ref[0:1, :] = acc_ref[0:1, :] + jnp.sum(weighted, axis=0, keepdims=True)

    @pl.when(r == pl.num_programs(0) - 1)
    def _():
        # Single XLU cross-lane reduce + single (masked) scalar store.
        out_ref[...] = jnp.sum(acc_ref[...], keepdims=True) * inv_total


def weighted_l1_loss(pred, noise, t, loss_weight):
    B, C, H, W = pred.shape
    HW = H * W
    R = B * C
    pred2 = pred.reshape(R, HW).astype(jnp.float32)
    noise2 = noise.reshape(R, HW).astype(jnp.float32)
    w = jnp.repeat(loss_weight[t].astype(jnp.float32), C).reshape(R, 1)

    rows = _pick_row_block(R, HW)
    grid = (R // rows,)
    n_el = R * HW

    out = pl.pallas_call(
        partial(_weighted_l1_kernel, inv_total=1.0 / n_el),
        out_shape=jax.ShapeDtypeStruct((1, 1), jnp.float32),
        grid=grid,
        in_specs=[
            pl.BlockSpec((rows, 1), lambda r: (r, 0)),      # loss_weight column
            pl.BlockSpec((rows, HW), lambda r: (r, 0)),     # model_out
            pl.BlockSpec((rows, HW), lambda r: (r, 0)),     # noise
        ],
        out_specs=pl.BlockSpec((1, 1), lambda r: (0, 0)),   # VMEM-resident scalar
        scratch_shapes=[pltpu.VMEM((8, HW), jnp.float32)],  # vector partial sums
        compiler_params=pltpu.CompilerParams(
            dimension_semantics=("arbitrary",),
            vmem_limit_bytes=_VMEM_LIMIT_BYTES),
        cost_estimate=pl.CostEstimate(
            flops=4 * n_el, transcendentals=0, bytes_accessed=2 * n_el * 4 + 4),
    )(w, pred2, noise2)
    return out[0, 0]


# -----------------------------------------------------------------------------
# GaussianDiffusion.forward == p_losses(normalize(img), t, noise)
# -----------------------------------------------------------------------------
def gaussian_diffusion_forward(img, t, noise, model_fn, buffers):
    x_t = q_sample_normalized(
        img, t, noise,
        buffers["sqrt_alphas_cumprod"],
        buffers["sqrt_one_minus_alphas_cumprod"],
    )
    # TODO(synk): self.model is an external denoiser U-Net passed into GaussianDiffusion;
    # it is not part of this module and has no Pallas translation here — any JAX callable works.
    model_out = model_fn(x_t, t, None)
    return weighted_l1_loss(model_out, noise, t, buffers["loss_weight"])


# -----------------------------------------------------------------------------
# Pure-JAX reference + demo
# -----------------------------------------------------------------------------
def _reference_forward(img, t, noise, model_fn, buffers):
    B = img.shape[0]
    x_start = img.astype(jnp.float32) * 2.0 - 1.0
    c1 = buffers["sqrt_alphas_cumprod"][t].reshape(B, 1, 1, 1)
    c2 = buffers["sqrt_one_minus_alphas_cumprod"][t].reshape(B, 1, 1, 1)
    x_t = c1 * x_start + c2 * noise
    model_out = model_fn(x_t, t, None)
    loss = jnp.abs(model_out - noise).reshape(B, -1)
    loss = loss * buffers["loss_weight"][t].reshape(B, 1)
    return loss.mean()


def _toy_model(x, t, x_cond=None):
    # Deterministic stand-in for the external U-Net denoiser (see TODO above).
    return jnp.tanh(x) + 0.001 * t.astype(jnp.float32).reshape(-1, 1, 1, 1)


if __name__ == "__main__":
    key = jax.random.PRNGKey(0)
    k_img, k_t, k_noise = jax.random.split(key, 3)

    B, C, H, W = 2, 4, 16, 16
    T = 1000
    buffers = make_diffusion_buffers(timesteps=T)

    img = jax.random.uniform(k_img, (B, C, H, W), dtype=jnp.float32)       # images in [0, 1]
    t = jax.random.randint(k_t, (B,), 0, T, dtype=jnp.int32)               # torch.randint equivalent
    noise = jax.random.normal(k_noise, (B, C, H, W), dtype=jnp.float32)    # torch.randn_like equivalent

    loss = gaussian_diffusion_forward(img, t, noise, _toy_model, buffers)
    loss = jax.block_until_ready(loss)

    ref = _reference_forward(img, t, noise, _toy_model, buffers)
    assert loss.shape == () and loss.dtype == jnp.float32
    assert jnp.allclose(loss, ref, atol=1e-5, rtol=1e-5), f"mismatch: {loss} vs {ref}"

    print("KERNEL_OK")
</pallas_src>

<mosaic_0001>
module attributes {stable_mosaic.version = 11 : i64} {
  func.func @_q_sample_kernel(%arg0: i32, %arg1: memref<8x1xf32, #tpu.memory_space<vmem>>, %arg2: memref<8x1xf32, #tpu.memory_space<vmem>>, %arg3: memref<8x256xf32, #tpu.memory_space<vmem>>, %arg4: memref<8x256xf32, #tpu.memory_space<vmem>>, %arg5: memref<8x256xf32, #tpu.memory_space<vmem>>) attributes {dimension_semantics = [#tpu.dimension_semantics<parallel>], iteration_bounds = array<i64: 1>, scalar_prefetch = 0 : i64, scratch_operands = 0 : i64, tpu.core_type = #tpu.core_type<tc>, window_params = [{transform_indices = @transform_0, window_bounds = array<i64: 8, 1>}, {transform_indices = @transform_1, window_bounds = array<i64: 8, 1>}, {transform_indices = @transform_2, window_bounds = array<i64: 8, 256>}, {transform_indices = @transform_3, window_bounds = array<i64: 8, 256>}, {transform_indices = @transform_4, window_bounds = array<i64: 8, 256>}]} {
    %c0 = arith.constant 0 : index
    %c0_0 = arith.constant 0 : index
    %0 = vector.load %arg3[%c0, %c0_0] : memref<8x256xf32, #tpu.memory_space<vmem>>, vector<8x256xf32>
    %cst = arith.constant 2.000000e+00 : f32
    %1 = vector.broadcast %cst : f32 to vector<8x256xf32>
    %2 = arith.mulf %0, %1 : vector<8x256xf32>
    %cst_1 = arith.constant 1.000000e+00 : f32
    %3 = vector.broadcast %cst_1 : f32 to vector<8x256xf32>
    %4 = arith.subf %2, %3 : vector<8x256xf32>
    %c0_2 = arith.constant 0 : index
    %c0_3 = arith.constant 0 : index
    %5 = vector.load %arg1[%c0_2, %c0_3] : memref<8x1xf32, #tpu.memory_space<vmem>>, vector<8x1xf32>
    %6 = vector.broadcast %5 : vector<8x1xf32> to vector<8x256xf32>
    %7 = arith.mulf %6, %4 : vector<8x256xf32>
    %c0_4 = arith.constant 0 : index
    %c0_5 = arith.constant 0 : index
    %8 = vector.load %arg2[%c0_4, %c0_5] : memref<8x1xf32, #tpu.memory_space<vmem>>, vector<8x1xf32>
    %c0_6 = arith.constant 0 : index
    %c0_7 = arith.constant 0 : index
    %9 = vector.load %arg4[%c0_6, %c0_7] : memref<8x256xf32, #tpu.memory_space<vmem>>, vector<8x256xf32>
    %10 = vector.broadcast %8 : vector<8x1xf32> to vector<8x256xf32>
    %11 = arith.mulf %10, %9 : vector<8x256xf32>
    %12 = arith.addf %7, %11 : vector<8x256xf32>
    %c0_8 = arith.constant 0 : index
    %c0_9 = arith.constant 0 : index
    %13 = vector.load %arg5[%c0_8, %c0_9] : memref<8x256xf32, #tpu.memory_space<vmem>>, vector<8x256xf32>
    tpu.vector_store %arg5[%c0_8, %c0_9], %12 {strides = array<i32>} : memref<8x256xf32, #tpu.memory_space<vmem>>, vector<8x256xf32>,
    return
  }
  func.func @transform_0(%arg0: i32) -> (i32, i32) {
    %c0_i32 = arith.constant 0 : i32
    %c0_i32_0 = arith.constant 0 : i32
    return %arg0, %c0_i32 : i32, i32
  }
  func.func @transform_1(%arg0: i32) -> (i32, i32) {
    %c0_i32 = arith.constant 0 : i32
    %c0_i32_0 = arith.constant 0 : i32
    return %arg0, %c0_i32 : i32, i32
  }
  func.func @transform_2(%arg0: i32) -> (i32, i32) {
    %c0_i32 = arith.constant 0 : i32
    %c0_i32_0 = arith.constant 0 : i32
    return %arg0, %c0_i32 : i32, i32
  }
  func.func @transform_3(%arg0: i32) -> (i32, i32) {
    %c0_i32 = arith.constant 0 : i32
    %c0_i32_0 = arith.constant 0 : i32
    return %arg0, %c0_i32 : i32, i32
  }
  func.func @transform_4(%arg0: i32) -> (i32, i32) {
    %c0_i32 = arith.constant 0 : i32
    %c0_i32_0 = arith.constant 0 : i32
    return %arg0, %c0_i32 : i32, i32
  }
}

</mosaic_0001>

<bundles_post_ra>
// kernel: tpu_custom_call.1
= control target key start
LH: loop header
LB: loop body
LE: loop exit
PB: predicated region body
PF: predicated region fallthrough
CT: control target
= control target key end

     0   :  { %9 = vsyncpa [#allocation3], 0  ;;  %s191_s0 = inlined_call_operand.vmem [shape: f32[8,1], index: 0, kind: input, shape index: {}]   ;;  %s192_s1 = inlined_call_operand.vmem [shape: f32[8,1], index: 1, kind: input, shape index: {}]   ;;  %s193_s2 = inlined_call_operand.vmem [shape: f32[8,256], index: 2, kind: input, shape index: {}]   ;;  %s194_s3 = inlined_call_operand.hbm [shape: f32[8,256], index: 3, kind: input, shape index: {}]   ;;  %s195_s4 = inlined_call_operand.hbm [shape: f32[8,256], index: 4, kind: output, shape index: {}]  }
   0x1   :  { %10 = vsyncpa [#allocation4], 0  ;;  %s127_s15 = smov [#allocation2]   ;;  %s79_s19 = scalar_lea.hbm %s194_s3, 256 }
   0x2   :  { %s23_s16 = sshll.u32 %s127_s15, 4  ;;  %p80_p0 = scmp.ne.s32.totalorder %s194_s3, %s79_s19  ;;  %s24_s16 = int_to_ptr.vmem [resolvable:$true] %s23_s16 }
   0x3   :  { %p83_p1 = scmp.lt.u32.totalorder %s79_s19, %s194_s3 }
   0x5   :  { %p85_p2 = pnand %p83_p1, %p80_p0 }
   0x7   :  { %88 = shalt.err (!%p85_p2)
}
   0x8   :  { %s89_s24 = scalar_lea.vmem %s24_s16, 256  ;;  %p94_p4 = scmp.lt.s32.totalorder %s24_s16, %s24_s16 }
   0x9   :  { %p90_p3 = scmp.ne.s32.totalorder %s24_s16, %s89_s24  ;;  %p95_p5 = scmp.lt.s32.totalorder %s89_s24, %s89_s24 }
   0xb   :  { %p96_p6 = por %p95_p5, %p94_p4 }
   0xd   :  { %p97_p7 = pnand %p96_p6, %p90_p3 }
   0xf   :  { %100 = shalt.err (!%p97_p7)
}
  0x10   :  { %26 = dma.hbm_to_vmem [thread:$0]  %s194_s3, 256, %s24_s16, [#allocation3]  }
  0x11   :  { %123 = dma.done.wait [#allocation3], 256  }
  0x12   :  { %124 = vsyncadd [#allocation3], 4294967040  ;;  %v128_v0 = vmov 0   ;;  %v36_v1 = vld [vmem:[%s191_s0] sm:$0xff]  ;;  %v31_v4 = vld [vmem:[%s193_s2 + $0x8] sm:$0xff]  ;;  %s129_s0 = smov [#allocation5]  }
  0x13   :  { %78 = vset.pattern.permute.xlu0 %v128_v0  ;;  %v44_v2 = vld [vmem:[%s192_s1] sm:$0xff]  ;;  %v33_v6 = vmul.f32 2.0, %v31_v4  ;;  %v45_v10 = vld [vmem:[#allocation2] sm:$0xff]  ;;  %s64_s8 = sshll.u32 %s129_s0, 4  ;;  %s65_s8 = int_to_ptr.vmem [resolvable:$true] %s64_s8 }
  0x14   :  { %39 = vperm.xlu0 %78, %v36_v1   ;;  %v30_v3 = vld [vmem:[%s193_s2] sm:$0xff]  ;;  %s101_s1 = scalar_lea.vmem %s65_s8, 256  ;;  %p106_p9 = scmp.lt.s32.totalorder %s65_s8, %s65_s8 }
  0x15   :  { %v32_v5 = vmul.f32 2.0, %v30_v3  ;;  %v74_v9 = vadd.f32 -1.0, %v33_v6  ;;  %v46_v11 = vld [vmem:[#allocation2 + $0x8] sm:$0xff]  ;;  %p102_p8 = scmp.ne.s32.totalorder %s65_s8, %s101_s1  ;;  %p107_p10 = scmp.lt.s32.totalorder %s101_s1, %s101_s1 }
  0x17   :  { %v73_v8 = vadd.f32 -1.0, %v32_v5  ;;  %p108_p11 = por %p107_p10, %p106_p9 }
  0x18   :  { %49 = vperm.xlu0 %78, %v44_v2  }
  0x19   :  { %p109_p12 = pnand %p108_p11, %p102_p8 }
  0x93   :  { %v40_v7 = vpop.permute.xlu0 %39 }
  0x94   :  { %v42_v13 = vmul.f32 %v73_v8, %v40_v7  ;;  %v43_v14 = vmul.f32 %v74_v9, %v40_v7 }
  0x97   :  { %v50_v12 = vpop.permute.xlu0 %49 }
  0x98   :  { %v52_v15 = vmul.f32 %v50_v12, %v45_v10  ;;  %v53_v16 = vmul.f32 %v50_v12, %v46_v11 }
  0x9a   :  { %v54_v17 = vadd.f32 %v52_v15, %v42_v13  ;;  %v55_v18 = vadd.f32 %v53_v16, %v43_v14 }
  0x9c   :  { %56 = vst [vmem:[#allocation5] sm:$0xff] %v54_v17  ;;  %57 = vst [vmem:[#allocation5 + $0x8] sm:$0xff] %v55_v18 }
  0x9d   :  { %112 = shalt.err (!%p109_p12)
}
  0x9e   :  { %s113_s10 = scalar_lea.hbm %s195_s4, 256 }
  0x9f   :  { %p114_p13 = scmp.ne.s32.totalorder %s195_s4, %s113_s10  ;;  %p117_p0 = scmp.lt.u32.totalorder %s113_s10, %s195_s4 }
  0xa1   :  { %p119_p1 = pnand %p117_p0, %p114_p13 }
  0xa3   :  { %122 = shalt.err (!%p119_p1)
}
  0xa4   :  { %67 = dma.vmem_to_hbm [thread:$0]  %s65_s8, 256, %s195_s4, [#allocation4]  }
  0xa5   :  { %125 = dma.done.wait [#allocation4], 256  }
  0xa6   :  { %126 = vsyncadd [#allocation4], 4294967040 }
  0xa7   :  { %71 = vsyncpa [#allocation3], 1 }
  0xa8   :  { %72 = vsyncpa [#allocation4], 1 }

</bundles_post_ra>
